<compile_context>
chip_gen: v7x
topology: tpu7x:2x2x1
jax: 0.10.0
libtpu: 0.0.40
codegen_flags: <defaults>
</compile_context>

<pallas_src>
import math

import jax
import jax.numpy as jnp
from jax.experimental import pallas as pl
from jax.experimental.pallas import tpu as pltpu


def _round_up(x, m):
    return ((x + m - 1) // m) * m


def discriminator_kernel(x_ref, w0_ref, b0_ref, w1_ref, b1_ref, w2_ref, b2_ref,
                         out_ref):
    # Layer 0: Linear(D_in -> H) + ReLU   (Dropout = identity in eval mode)
    h = jnp.dot(x_ref[...], w0_ref[...], preferred_element_type=jnp.float32)
    h = jnp.maximum(h + b0_ref[...].astype(jnp.float32), 0.0)
    # Layer 1: Linear(H -> H) + ReLU      (Dropout = identity in eval mode)
    h = jnp.dot(h.astype(w1_ref.dtype), w1_ref[...],
                preferred_element_type=jnp.float32)
    h = jnp.maximum(h + b1_ref[...].astype(jnp.float32), 0.0)
    # Classifier: Linear(H -> C_pad). Padded lanes carry a -1e30 (f32) bias so
    # they contribute exp(.) == 0 to the LSE and never win the row max.
    logits = jnp.dot(h.astype(w2_ref.dtype), w2_ref[...],
                     preferred_element_type=jnp.float32)
    logits = logits + b2_ref[...].astype(jnp.float32)
    # log_softmax over dim=1 (last dim), numerically stable, all f32.
    m = jnp.max(logits, axis=-1, keepdims=True)
    shifted = logits - m
    lse = jnp.log(jnp.sum(jnp.exp(shifted), axis=-1, keepdims=True))
    out_ref[...] = (shifted - lse).astype(out_ref.dtype)


def _vmem_capacity_bytes():
    try:
        return int(pltpu.get_tpu_info().vmem_capacity_bytes)
    except Exception:
        return 64 << 20  # conservative: v7x per-TensorCore VMEM


def discriminator_forward(x, params, *, batch_tile=256,
                          compute_dtype=jnp.bfloat16):
    """x: (B, D_in). params: (w0,b0,w1,b1,w2,b2) stored (in, out) / (1, out)."""
    w0, b0, w1, b1, w2, b2 = params
    B, D_in = x.shape
    H = w0.shape[1]
    C = w2.shape[1]

    # Feed the MXU bf16 operands; biases stay f32 (added to the f32 accum).
    x = x.astype(compute_dtype)
    w0 = w0.astype(compute_dtype)
    w1 = w1.astype(compute_dtype)
    w2 = w2.astype(compute_dtype)
    b0 = b0.astype(jnp.float32)
    b1 = b1.astype(jnp.float32)
    b2 = b2.astype(jnp.float32)

    # Lane-dense classifier padding (multiple of 128 lanes).  Pad bias is
    # built in f32 so -1e30 never saturates in a narrow dtype.
    C_pad = _round_up(max(C, 128), 128)
    if C_pad != C:
        w2 = jnp.zeros((H, C_pad), w2.dtype).at[:, :C].set(w2)
        b2 = jnp.full((1, C_pad), -1e30, jnp.float32).at[:, :C].set(b2)

    # Batch tile: multiple of 8 sublanes, capped by requested tile size.  If
    # the whole batch would be a single tile but is splittable, split in two
    # so the "parallel" batch axis lands work on both v7x TensorCores.
    B8 = _round_up(B, 8)
    TB = _round_up(min(batch_tile, B8), 8)
    if B8 >= 16 and B8 // TB < 2:
        TB = _round_up((B8 + 1) // 2, 8)
    B_pad = _round_up(B, TB)
    if B_pad != B:
        x = jnp.pad(x, ((0, B_pad - B), (0, 0)))

    grid = (B_pad // TB,)
    weight_args = (w0, b0, w1, b1, w2, b2)

    def nbytes(a):
        return a.size * a.dtype.itemsize

    weight_bytes = sum(nbytes(a) for a in weight_args)

    # Advisory cost model so XLA can overlap this custom call with neighbors.
    cost = pl.CostEstimate(
        flops=2 * B_pad * (D_in * H + H * H + H * C_pad),
        transcendentals=B_pad * C_pad,
        bytes_accessed=(B_pad * D_in * x.dtype.itemsize + weight_bytes
                        + B_pad * C_pad * 4),
    )

    vmem_cap = max(32 << 20, int(0.75 * _vmem_capacity_bytes()))

    def build_call(single_buffer_weights):
        # x / out stream per grid step; weights/biases have a constant
        # index_map so they are DMA'd from HBM once and stay VMEM-resident.
        def const(shape):
            if single_buffer_weights:
                return pl.BlockSpec(shape, lambda i: (0, 0),
                                    pipeline_mode=pl.Buffered(1))
            return pl.BlockSpec(shape, lambda i: (0, 0))

        in_specs = [pl.BlockSpec((TB, D_in), lambda i: (i, 0))]
        in_specs += [const(a.shape) for a in weight_args]
        out_spec = pl.BlockSpec((TB, C_pad), lambda i: (i, 0))

        # VMEM budget: resident weights (x1 or x2 pipeline buffers) +
        # double-buffered x/out tiles + f32 intermediates + headroom, capped
        # by a per-generation limit derived from the chip's VMEM capacity.
        weight_buffers = 1 if single_buffer_weights else 2
        stream_bytes = 2 * (TB * D_in * x.dtype.itemsize + TB * C_pad * 4)
        scratch_bytes = 4 * TB * max(H, C_pad) * 4
        vmem_limit = (weight_buffers * weight_bytes + stream_bytes
                      + scratch_bytes)
        vmem_limit = int(1.25 * vmem_limit) + (4 << 20)
        vmem_limit = min(max(vmem_limit, 16 << 20), vmem_cap)

        return pl.pallas_call(
            discriminator_kernel,
            out_shape=jax.ShapeDtypeStruct((B_pad, C_pad), jnp.float32),
            grid=grid,
            in_specs=in_specs,
            out_specs=out_spec,
            cost_estimate=cost,
            compiler_params=pltpu.CompilerParams(
                dimension_semantics=("parallel",),  # megacore sharding on v7x
                vmem_limit_bytes=vmem_limit,
            ),
        )

    out_padded = None
    last_err = None
    # Prefer single-buffered resident weights (pl.Buffered(1)); fall back to
    # the default double-buffered pipeline if this build rejects it.
    for single_buffer_weights in (True, False):
        try:
            out_padded = build_call(single_buffer_weights)(x, *weight_args)
            break
        except Exception as e:  # fallback to the previously-validated path
            last_err = e
    if out_padded is None:
        raise last_err

    return out_padded[:B, :C]


def init_params(key, input_size, hidden_size, num_classes, dtype=jnp.float32):
    # Deterministic synthetic parameters (nn.Linear-style init, stored (in, out)).
    ks = jax.random.split(key, 6)

    def lin(kw, kb, fan_in, fan_out):
        bound = 1.0 / math.sqrt(fan_in)
        w = jax.random.uniform(kw, (fan_in, fan_out), jnp.float32, -bound, bound)
        b = jax.random.uniform(kb, (1, fan_out), jnp.float32, -bound, bound)
        return w.astype(dtype), b.astype(dtype)

    w0, b0 = lin(ks[0], ks[1], input_size, hidden_size)
    w1, b1 = lin(ks[2], ks[3], hidden_size, hidden_size)
    w2, b2 = lin(ks[4], ks[5], hidden_size, num_classes)
    return (w0, b0, w1, b1, w2, b2)


def reference_forward_f32(x, params):
    w0, b0, w1, b1, w2, b2 = (p.astype(jnp.float32) for p in params)
    xf = x.astype(jnp.float32)
    h = jnp.maximum(xf @ w0 + b0, 0.0)
    h = jnp.maximum(h @ w1 + b1, 0.0)
    logits = h @ w2 + b2
    return jax.nn.log_softmax(logits, axis=1)


def reference_forward_matched(x, params, compute_dtype=jnp.bfloat16):
    # Mirrors the kernel's numerics: bf16 MXU operands, f32 accumulation/bias.
    w0, b0, w1, b1, w2, b2 = params
    h = jnp.dot(x.astype(compute_dtype), w0.astype(compute_dtype),
                preferred_element_type=jnp.float32)
    h = jnp.maximum(h + b0.astype(jnp.float32), 0.0)
    h = jnp.dot(h.astype(compute_dtype), w1.astype(compute_dtype),
                preferred_element_type=jnp.float32)
    h = jnp.maximum(h + b1.astype(jnp.float32), 0.0)
    logits = jnp.dot(h.astype(compute_dtype), w2.astype(compute_dtype),
                     preferred_element_type=jnp.float32)
    logits = logits + b2.astype(jnp.float32)
    return jax.nn.log_softmax(logits, axis=1)


if __name__ == "__main__":
    # Small shapes consistent with the module (scaled-down input/hidden dims).
    batch = 8
    input_size = 64      # stands in for 768 * 2
    hidden_size = 32     # stands in for 768
    num_classes = 6

    key = jax.random.PRNGKey(0)
    kx, kp = jax.random.split(key)
    x = jax.random.normal(kx, (batch, input_size), dtype=jnp.float32)
    params = init_params(kp, input_size, hidden_size, num_classes)

    out = discriminator_forward(x, params)
    out = jax.block_until_ready(out)

    assert out.shape == (batch, num_classes), out.shape
    assert bool(jnp.all(jnp.isfinite(out))), "non-finite output"

    ref_matched = reference_forward_matched(x, params)
    ref_f32 = reference_forward_f32(x, params)
    assert jnp.allclose(out, ref_matched, atol=2e-3, rtol=2e-3), \
        "mismatch vs bf16-matched reference"
    assert jnp.allclose(out, ref_f32, atol=5e-2, rtol=5e-2), \
        "mismatch vs f32 reference"

    print("KERNEL_OK")
</pallas_src>

<mosaic_0001>
module attributes {stable_mosaic.version = 11 : i64} {
  func.func @discriminator_kernel(%arg0: i32, %arg1: memref<8x64xbf16, #tpu.memory_space<vmem>>, %arg2: memref<64x32xbf16, #tpu.memory_space<vmem>>, %arg3: memref<1x32xf32, #tpu.memory_space<vmem>>, %arg4: memref<32x32xbf16, #tpu.memory_space<vmem>>, %arg5: memref<1x32xf32, #tpu.memory_space<vmem>>, %arg6: memref<32x128xbf16, #tpu.memory_space<vmem>>, %arg7: memref<1x128xf32, #tpu.memory_space<vmem>>, %arg8: memref<8x128xf32, #tpu.memory_space<vmem>>) attributes {dimension_semantics = [#tpu.dimension_semantics<parallel>], iteration_bounds = array<i64: 1>, scalar_prefetch = 0 : i64, scratch_operands = 0 : i64, tpu.core_type = #tpu.core_type<tc>, window_params = [{transform_indices = @transform_0, window_bounds = array<i64: 8, 64>}, {pipeline_mode = #tpu.pipeline_mode<synchronous>, transform_indices = @transform_1, window_bounds = array<i64: 64, 32>}, {pipeline_mode = #tpu.pipeline_mode<synchronous>, transform_indices = @transform_2, window_bounds = array<i64: 1, 32>}, {pipeline_mode = #tpu.pipeline_mode<synchronous>, transform_indices = @transform_3, window_bounds = array<i64: 32, 32>}, {pipeline_mode = #tpu.pipeline_mode<synchronous>, transform_indices = @transform_4, window_bounds = array<i64: 1, 32>}, {pipeline_mode = #tpu.pipeline_mode<synchronous>, transform_indices = @transform_5, window_bounds = array<i64: 32, 128>}, {pipeline_mode = #tpu.pipeline_mode<synchronous>, transform_indices = @transform_6, window_bounds = array<i64: 1, 128>}, {transform_indices = @transform_7, window_bounds = array<i64: 8, 128>}]} {
    %c0 = arith.constant 0 : index
    %c0_0 = arith.constant 0 : index
    %0 = vector.load %arg1[%c0, %c0_0] : memref<8x64xbf16, #tpu.memory_space<vmem>>, vector<8x64xbf16>
    %c0_1 = arith.constant 0 : index
    %c0_2 = arith.constant 0 : index
    %1 = vector.load %arg2[%c0_1, %c0_2] : memref<64x32xbf16, #tpu.memory_space<vmem>>, vector<64x32xbf16>
    %cst = arith.constant dense<0.000000e+00> : vector<8x32xf32>
    %2 = tpu.matmul %0, %1, %cst {dimension_numbers = #tpu.dot_dimension_numbers<[1], [0], [0], [1], [0, 0, 1, 1], [], []>} : vector<8x64xbf16>, vector<64x32xbf16>, vector<8x32xf32> -> vector<8x32xf32>
    %c0_3 = arith.constant 0 : index
    %c0_4 = arith.constant 0 : index
    %3 = vector.load %arg3[%c0_3, %c0_4] : memref<1x32xf32, #tpu.memory_space<vmem>>, vector<1x32xf32>
    %4 = vector.broadcast %3 : vector<1x32xf32> to vector<8x32xf32>
    %5 = arith.addf %2, %4 : vector<8x32xf32>
    %cst_5 = arith.constant 0.000000e+00 : f32
    %6 = vector.broadcast %cst_5 : f32 to vector<8x32xf32>
    %7 = arith.maximumf %5, %6 : vector<8x32xf32>
    %8 = arith.truncf %7 : vector<8x32xf32> to vector<8x32xbf16>
    %c0_6 = arith.constant 0 : index
    %c0_7 = arith.constant 0 : index
    %9 = vector.load %arg4[%c0_6, %c0_7] : memref<32x32xbf16, #tpu.memory_space<vmem>>, vector<32x32xbf16>
    %cst_8 = arith.constant dense<0.000000e+00> : vector<8x32xf32>
    %10 = tpu.matmul %8, %9, %cst_8 {dimension_numbers = #tpu.dot_dimension_numbers<[1], [0], [0], [1], [0, 0, 1, 1], [], []>} : vector<8x32xbf16>, vector<32x32xbf16>, vector<8x32xf32> -> vector<8x32xf32>
    %c0_9 = arith.constant 0 : index
    %c0_10 = arith.constant 0 : index
    %11 = vector.load %arg5[%c0_9, %c0_10] : memref<1x32xf32, #tpu.memory_space<vmem>>, vector<1x32xf32>
    %12 = vector.broadcast %11 : vector<1x32xf32> to vector<8x32xf32>
    %13 = arith.addf %10, %12 : vector<8x32xf32>
    %cst_11 = arith.constant 0.000000e+00 : f32
    %14 = vector.broadcast %cst_11 : f32 to vector<8x32xf32>
    %15 = arith.maximumf %13, %14 : vector<8x32xf32>
    %16 = arith.truncf %15 : vector<8x32xf32> to vector<8x32xbf16>
    %c0_12 = arith.constant 0 : index
    %c0_13 = arith.constant 0 : index
    %17 = vector.load %arg6[%c0_12, %c0_13] : memref<32x128xbf16, #tpu.memory_space<vmem>>, vector<32x128xbf16>
    %cst_14 = arith.constant dense<0.000000e+00> : vector<8x128xf32>
    %18 = tpu.matmul %16, %17, %cst_14 {dimension_numbers = #tpu.dot_dimension_numbers<[1], [0], [0], [1], [0, 0, 1, 1], [], []>} : vector<8x32xbf16>, vector<32x128xbf16>, vector<8x128xf32> -> vector<8x128xf32>
    %c0_15 = arith.constant 0 : index
    %c0_16 = arith.constant 0 : index
    %19 = vector.load %arg7[%c0_15, %c0_16] : memref<1x128xf32, #tpu.memory_space<vmem>>, vector<1x128xf32>
    %20 = vector.broadcast %19 : vector<1x128xf32> to vector<8x128xf32>
    %21 = arith.addf %18, %20 : vector<8x128xf32>
    %cst_17 = arith.constant dense<0xFF800000> : vector<8xf32>
    %22 = vector.multi_reduction <maximumf>, %21, %cst_17 [1] : vector<8x128xf32> to vector<8xf32>
    %23 = vector.shape_cast %22 : vector<8xf32> to vector<8x1xf32>
    %24 = vector.broadcast %23 : vector<8x1xf32> to vector<8x128xf32>
    %25 = arith.subf %21, %24 : vector<8x128xf32>
    %26 = math.exp %25 : vector<8x128xf32>
    %cst_18 = arith.constant dense<0.000000e+00> : vector<8xf32>
    %27 = vector.multi_reduction <add>, %26, %cst_18 [1] : vector<8x128xf32> to vector<8xf32>
    %28 = vector.shape_cast %27 : vector<8xf32> to vector<8x1xf32>
    %29 = math.log %28 : vector<8x1xf32>
    %30 = vector.broadcast %29 : vector<8x1xf32> to vector<8x128xf32>
    %31 = arith.subf %25, %30 : vector<8x128xf32>
    %c0_19 = arith.constant 0 : index
    %c0_20 = arith.constant 0 : index
    %32 = vector.load %arg8[%c0_19, %c0_20] : memref<8x128xf32, #tpu.memory_space<vmem>>, vector<8x128xf32>
    tpu.vector_store %arg8[%c0_19, %c0_20], %31 {strides = array<i32>} : memref<8x128xf32, #tpu.memory_space<vmem>>, vector<8x128xf32>,
    return
  }
  func.func @transform_0(%arg0: i32) -> (i32, i32) {
    %c0_i32 = arith.constant 0 : i32
    %c0_i32_0 = arith.constant 0 : i32
    return %arg0, %c0_i32 : i32, i32
  }
  func.func @transform_1(%arg0: i32) -> (i32, i32) {
    %c0_i32 = arith.constant 0 : i32
    %c0_i32_0 = arith.constant 0 : i32
    %c0_i32_1 = arith.constant 0 : i32
    return %c0_i32, %c0_i32_0 : i32, i32
  }
  func.func @transform_2(%arg0: i32) -> (i32, i32) {
    %c0_i32 = arith.constant 0 : i32
    %c0_i32_0 = arith.constant 0 : i32
    %c0_i32_1 = arith.constant 0 : i32
    return %c0_i32, %c0_i32_0 : i32, i32
  }
  func.func @transform_3(%arg0: i32) -> (i32, i32) {
    %c0_i32 = arith.constant 0 : i32
    %c0_i32_0 = arith.constant 0 : i32
    %c0_i32_1 = arith.constant 0 : i32
    return %c0_i32, %c0_i32_0 : i32, i32
  }
  func.func @transform_4(%arg0: i32) -> (i32, i32) {
    %c0_i32 = arith.constant 0 : i32
    %c0_i32_0 = arith.constant 0 : i32
    %c0_i32_1 = arith.constant 0 : i32
    return %c0_i32, %c0_i32_0 : i32, i32
  }
  func.func @transform_5(%arg0: i32) -> (i32, i32) {
    %c0_i32 = arith.constant 0 : i32
    %c0_i32_0 = arith.constant 0 : i32
    %c0_i32_1 = arith.constant 0 : i32
    return %c0_i32, %c0_i32_0 : i32, i32
  }
  func.func @transform_6(%arg0: i32) -> (i32, i32) {
    %c0_i32 = arith.constant 0 : i32
    %c0_i32_0 = arith.constant 0 : i32
    %c0_i32_1 = arith.constant 0 : i32
    return %c0_i32, %c0_i32_0 : i32, i32
  }
  func.func @transform_7(%arg0: i32) -> (i32, i32) {
    %c0_i32 = arith.constant 0 : i32
    %c0_i32_0 = arith.constant 0 : i32
    return %arg0, %c0_i32 : i32, i32
  }
}

module attributes {stable_mosaic.version = 11 : i64} {
  func.func @discriminator_kernel(%arg0: i32, %arg1: memref<8x64xbf16, #tpu.memory_space<vmem>>, %arg2: memref<64x32xbf16, #tpu.memory_space<vmem>>, %arg3: memref<1x32xf32, #tpu.memory_space<vmem>>, %arg4: memref<32x32xbf16, #tpu.memory_space<vmem>>, %arg5: memref<1x32xf32, #tpu.memory_space<vmem>>, %arg6: memref<32x128xbf16, #tpu.memory_space<vmem>>, %arg7: memref<1x128xf32, #tpu.memory_space<vmem>>, %arg8: memref<8x128xf32, #tpu.memory_space<vmem>>) attributes {dimension_semantics = [#tpu.dimension_semantics<parallel>], iteration_bounds = array<i64: 1>, scalar_prefetch = 0 : i64, scratch_operands = 0 : i64, tpu.core_type = #tpu.core_type<tc>, window_params = [{transform_indices = @transform_0, window_bounds = array<i64: 8, 64>}, {pipeline_mode = #tpu.pipeline_mode<synchronous>, transform_indices = @transform_1, window_bounds = array<i64: 64, 32>}, {pipeline_mode = #tpu.pipeline_mode<synchronous>, transform_indices = @transform_2, window_bounds = array<i64: 1, 32>}, {pipeline_mode = #tpu.pipeline_mode<synchronous>, transform_indices = @transform_3, window_bounds = array<i64: 32, 32>}, {pipeline_mode = #tpu.pipeline_mode<synchronous>, transform_indices = @transform_4, window_bounds = array<i64: 1, 32>}, {pipeline_mode = #tpu.pipeline_mode<synchronous>, transform_indices = @transform_5, window_bounds = array<i64: 32, 128>}, {pipeline_mode = #tpu.pipeline_mode<synchronous>, transform_indices = @transform_6, window_bounds = array<i64: 1, 128>}, {transform_indices = @transform_7, window_bounds = array<i64: 8, 128>}]} {
    %c0 = arith.constant 0 : index
    %c0_0 = arith.constant 0 : index
    %0 = vector.load %arg1[%c0, %c0_0] : memref<8x64xbf16, #tpu.memory_space<vmem>>, vector<8x64xbf16>
    %c0_1 = arith.constant 0 : index
    %c0_2 = arith.constant 0 : index
    %1 = vector.load %arg2[%c0_1, %c0_2] : memref<64x32xbf16, #tpu.memory_space<vmem>>, vector<64x32xbf16>
    %cst = arith.constant dense<0.000000e+00> : vector<8x32xf32>
    %2 = tpu.matmul %0, %1, %cst {dimension_numbers = #tpu.dot_dimension_numbers<[1], [0], [0], [1], [0, 0, 1, 1], [], []>} : vector<8x64xbf16>, vector<64x32xbf16>, vector<8x32xf32> -> vector<8x32xf32>
    %c0_3 = arith.constant 0 : index
    %c0_4 = arith.constant 0 : index
    %3 = vector.load %arg3[%c0_3, %c0_4] : memref<1x32xf32, #tpu.memory_space<vmem>>, vector<1x32xf32>
    %4 = vector.broadcast %3 : vector<1x32xf32> to vector<8x32xf32>
    %5 = arith.addf %2, %4 : vector<8x32xf32>
    %cst_5 = arith.constant 0.000000e+00 : f32
    %6 = vector.broadcast %cst_5 : f32 to vector<8x32xf32>
    %7 = arith.maximumf %5, %6 : vector<8x32xf32>
    %8 = arith.truncf %7 : vector<8x32xf32> to vector<8x32xbf16>
    %c0_6 = arith.constant 0 : index
    %c0_7 = arith.constant 0 : index
    %9 = vector.load %arg4[%c0_6, %c0_7] : memref<32x32xbf16, #tpu.memory_space<vmem>>, vector<32x32xbf16>
    %cst_8 = arith.constant dense<0.000000e+00> : vector<8x32xf32>
    %10 = tpu.matmul %8, %9, %cst_8 {dimension_numbers = #tpu.dot_dimension_numbers<[1], [0], [0], [1], [0, 0, 1, 1], [], []>} : vector<8x32xbf16>, vector<32x32xbf16>, vector<8x32xf32> -> vector<8x32xf32>
    %c0_9 = arith.constant 0 : index
    %c0_10 = arith.constant 0 : index
    %11 = vector.load %arg5[%c0_9, %c0_10] : memref<1x32xf32, #tpu.memory_space<vmem>>, vector<1x32xf32>
    %12 = vector.broadcast %11 : vector<1x32xf32> to vector<8x32xf32>
    %13 = arith.addf %10, %12 : vector<8x32xf32>
    %cst_11 = arith.constant 0.000000e+00 : f32
    %14 = vector.broadcast %cst_11 : f32 to vector<8x32xf32>
    %15 = arith.maximumf %13, %14 : vector<8x32xf32>
    %16 = arith.truncf %15 : vector<8x32xf32> to vector<8x32xbf16>
    %c0_12 = arith.constant 0 : index
    %c0_13 = arith.constant 0 : index
    %17 = vector.load %arg6[%c0_12, %c0_13] : memref<32x128xbf16, #tpu.memory_space<vmem>>, vector<32x128xbf16>
    %cst_14 = arith.constant dense<0.000000e+00> : vector<8x128xf32>
    %18 = tpu.matmul %16, %17, %cst_14 {dimension_numbers = #tpu.dot_dimension_numbers<[1], [0], [0], [1], [0, 0, 1, 1], [], []>} : vector<8x32xbf16>, vector<32x128xbf16>, vector<8x128xf32> -> vector<8x128xf32>
    %c0_15 = arith.constant 0 : index
    %c0_16 = arith.constant 0 : index
    %19 = vector.load %arg7[%c0_15, %c0_16] : memref<1x128xf32, #tpu.memory_space<vmem>>, vector<1x128xf32>
    %20 = vector.broadcast %19 : vector<1x128xf32> to vector<8x128xf32>
    %21 = arith.addf %18, %20 : vector<8x128xf32>
    %cst_17 = arith.constant dense<0xFF800000> : vector<8xf32>
    %22 = vector.multi_reduction <maximumf>, %21, %cst_17 [1] : vector<8x128xf32> to vector<8xf32>
    %23 = vector.shape_cast %22 : vector<8xf32> to vector<8x1xf32>
    %24 = vector.broadcast %23 : vector<8x1xf32> to vector<8x128xf32>
    %25 = arith.subf %21, %24 : vector<8x128xf32>
    %26 = math.exp %25 : vector<8x128xf32>
    %cst_18 = arith.constant dense<0.000000e+00> : vector<8xf32>
    %27 = vector.multi_reduction <add>, %26, %cst_18 [1] : vector<8x128xf32> to vector<8xf32>
    %28 = vector.shape_cast %27 : vector<8xf32> to vector<8x1xf32>
    %29 = math.log %28 : vector<8x1xf32>
    %30 = vector.broadcast %29 : vector<8x1xf32> to vector<8x128xf32>
    %31 = arith.subf %25, %30 : vector<8x128xf32>
    %c0_19 = arith.constant 0 : index
    %c0_20 = arith.constant 0 : index
    %32 = vector.load %arg8[%c0_19, %c0_20] : memref<8x128xf32, #tpu.memory_space<vmem>>, vector<8x128xf32>
    tpu.vector_store %arg8[%c0_19, %c0_20], %31 {strides = array<i32>} : memref<8x128xf32, #tpu.memory_space<vmem>>, vector<8x128xf32>,
    return
  }
  func.func @transform_0(%arg0: i32) -> (i32, i32) {
    %c0_i32 = arith.constant 0 : i32
    %c0_i32_0 = arith.constant 0 : i32
    return %arg0, %c0_i32 : i32, i32
  }
  func.func @transform_1(%arg0: i32) -> (i32, i32) {
    %c0_i32 = arith.constant 0 : i32
    %c0_i32_0 = arith.constant 0 : i32
    %c0_i32_1 = arith.constant 0 : i32
    return %c0_i32, %c0_i32_0 : i32, i32
  }
  func.func @transform_2(%arg0: i32) -> (i32, i32) {
    %c0_i32 = arith.constant 0 : i32
    %c0_i32_0 = arith.constant 0 : i32
    %c0_i32_1 = arith.constant 0 : i32
    return %c0_i32, %c0_i32_0 : i32, i32
  }
  func.func @transform_3(%arg0: i32) -> (i32, i32) {
    %c0_i32 = arith.constant 0 : i32
    %c0_i32_0 = arith.constant 0 : i32
    %c0_i32_1 = arith.constant 0 : i32
    return %c0_i32, %c0_i32_0 : i32, i32
  }
  func.func @transform_4(%arg0: i32) -> (i32, i32) {
    %c0_i32 = arith.constant 0 : i32
    %c0_i32_0 = arith.constant 0 : i32
    %c0_i32_1 = arith.constant 0 : i32
    return %c0_i32, %c0_i32_0 : i32, i32
  }
  func.func @transform_5(%arg0: i32) -> (i32, i32) {
    %c0_i32 = arith.constant 0 : i32
    %c0_i32_0 = arith.constant 0 : i32
    %c0_i32_1 = arith.constant 0 : i32
    return %c0_i32, %c0_i32_0 : i32, i32
  }
  func.func @transform_6(%arg0: i32) -> (i32, i32) {
    %c0_i32 = arith.constant 0 : i32
    %c0_i32_0 = arith.constant 0 : i32
    %c0_i32_1 = arith.constant 0 : i32
    return %c0_i32, %c0_i32_0 : i32, i32
  }
  func.func @transform_7(%arg0: i32) -> (i32, i32) {
    %c0_i32 = arith.constant 0 : i32
    %c0_i32_0 = arith.constant 0 : i32
    return %arg0, %c0_i32 : i32, i32
  }
}

</mosaic_0001>

<bundles_post_ra>
// kernel: tpu_custom_call.1
= control target key start
LH: loop header
LB: loop body
LE: loop exit
PB: predicated region body
PF: predicated region fallthrough
CT: control target
= control target key end

     0   :  { %v366_v1 = vmov 0.0   ;;  %vm367_vm0 = vmmov 0   ;;  %s462_s0 = inlined_call_operand.vmem [shape: bf16[8,64], index: 0, kind: input, shape index: {}]   ;;  %s463_s1 = inlined_call_operand.vmem [shape: bf16[64,32], index: 1, kind: input, shape index: {}]   ;;  %s464_s2 = inlined_call_operand.vmem [shape: f32[1,32], index: 2, kind: input, shape index: {}]   ;;  %s465_s3 = inlined_call_operand.vmem [shape: bf16[32,32], index: 3, kind: input, shape index: {}]   ;;  %s466_s4 = inlined_call_operand.vmem [shape: f32[1,32], index: 4, kind: input, shape index: {}]   ;;  %s467_s5 = inlined_call_operand.vmem [shape: bf16[32,128], index: 5, kind: input, shape index: {}]   ;;  %s468_s6 = inlined_call_operand.vmem [shape: f32[1,128], index: 6, kind: input, shape index: {}]   ;;  %s469_s7 = inlined_call_operand.hbm [shape: f32[8,128], index: 7, kind: output, shape index: {}]  }
   0x1   :  { %v330_v0 = vld [vmem:[%s463_s1] sm:$0xff]   ;;  %299 = vmatprep.subr.bf16.mxu0 %v366_v1  ;;  %311 = vmatprep.subr.bf16.mxu1 %v366_v1  ;;  %v331_v2 = vld [vmem:[%s463_s1 + $0x8] sm:$0xff]   ;;  %v332_v3 = vld [vmem:[%s463_s1 + $0x10] sm:$0xff]  }
   0x2   :  { %300 = vmatpush3.bf16.msra.mxu0 %v330_v0  ;;  %307 = vmatprep.mubr.msk.bf16.mxu0 %vm367_vm0, %v366_v1 }
   0x3   :  { %301 = vmatprep.subr.bf16.mxu0 %v366_v1  ;;  %315 = vmatprep.mubr.msk.bf16.mxu1 %vm367_vm0, %v366_v1 }
   0x6   :  { %302 = vmatpush3.bf16.msra.mxu0 %v331_v2 }
   0x7   :  { %303 = vmatprep.subr.bf16.mxu0 %v366_v1 }
   0x8   :  { %12 = vsyncpa [#allocation3], 0  ;;  %v333_v4 = vld [vmem:[%s463_s1 + $0x18] sm:$0xff]   ;;  %v28_v5 = vld [vmem:[%s462_s0] sm:$0xf]  ;;  %vm68_vm1 = vcmask 523264  }
   0x9   :  { %v334_v6 = vld [vmem:[%s465_s3] sm:$0xff]   ;;  %v335_v7 = vld [vmem:[%s465_s3 + $0x8] sm:$0xff]   ;;  %vm137_vm2 = vcmask 261120  }
   0xa   :  { %304 = vmatpush3.bf16.msra.mxu0 %v332_v3  ;;  %312 = vmatpush3.bf16.msra.mxu1 %v334_v6  ;;  %v274_v8 = vld [vmem:[%s464_s2] ss:$0 sm:$0xff]  ;;  %v337_v17 = vld [vmem:[%s467_s5 + $0x8] sm:$0xff]  }
   0xb   :  { %305 = vmatprep.subr.bf16.mxu0 %v366_v1  ;;  %313 = vmatprep.subr.bf16.mxu1 %v366_v1  ;;  %v336_v15 = vld [vmem:[%s467_s5] sm:$0xff]  }
   0xc   :  { %v280_v18 = vld [vmem:[%s466_s4] ss:$0 sm:$0xff]  ;;  %s368_s4 = smov [#allocation2]  }
   0xd   :  { %v284_v26 = vld [vmem:[%s468_s6] ss:$0 sm:$0xff]  ;;  %s266_s5 = sshll.u32 %s368_s4, 4  ;;  %s267_s5 = int_to_ptr.vmem [resolvable:$true] %s266_s5 }
   0xe   :  { %306 = vmatpush3.bf16.msra.mxu0 %v333_v4  ;;  %314 = vmatpush3.bf16.msra.mxu1 %v335_v7  ;;  %s342_s6 = scalar_lea.vmem %s267_s5, 128  ;;  %p347_p1 = scmp.lt.s32.totalorder %s267_s5, %s267_s5 }
   0xf   :  { %319 = vmatprep.subr.bf16.mxu1 %v366_v1  ;;  %p343_p0 = scmp.ne.s32.totalorder %s267_s5, %s342_s6  ;;  %p348_p2 = scmp.lt.s32.totalorder %s342_s6, %s342_s6 }
  0x11   :  { %308 = vmatmul.mubr.msk.bf16.vlgmr.msra.gmra.mrb[0].mxu0 %vm68_vm1, %v28_v5  ;;  %p349_p3 = por %p348_p2, %p347_p1 }
  0x13   :  { %p350_p4 = pnand %p349_p3, %p343_p0 }
  0xe4   :  { %v106_v9 = vpop.f32.mrb[0].mxu0 }
  0xe5   :  { %v107_v10 = vadd.f32 %v274_v8, %v106_v9  ;;  %v309_v11 = vpop.f32.mrb[1].mxu0 }
  0xe6   :  { %v109_v12 = vpop.f32.mrb[2].mxu0 }
  0xe7   :  { %v112_v13 = vmax.f32 %v107_v10, 0.0  ;;  %v310_v14 = vpop.f32.mrb[3].mxu0 }
  0xe9   :  { %v113_v16 = vpack.c.bf16 %v112_v13, %v112_v13 }
  0xeb   :  { %316 = vmatmul.mubr.msk.bf16.vlgmr.msra.gmra.mrb[0].mxu1 %vm137_vm2, %v113_v16 }
  0xec   :  { %320 = vmatpush3.bf16.msra.mxu1 %v336_v15  ;;  %323 = vmatprep.mubr.msk.bf16.mxu1 %vm367_vm0, %v366_v1 }
  0xed   :  { %321 = vmatprep.subr.bf16.mxu1 %v366_v1 }
  0xf0   :  { %322 = vmatpush3.bf16.msra.mxu1 %v337_v17 }
 0x1be   :  { %v175_v19 = vpop.f32.mrb[0].mxu1 }
 0x1bf   :  { %v176_v20 = vadd.f32 %v280_v18, %v175_v19  ;;  %v317_v21 = vpop.f32.mrb[1].mxu1 }
 0x1c0   :  { %v178_v22 = vpop.f32.mrb[2].mxu1 }
 0x1c1   :  { %v181_v23 = vmax.f32 %v176_v20, 0.0  ;;  %v318_v24 = vpop.f32.mrb[3].mxu1 }
 0x1c3   :  { %v182_v25 = vpack.c.bf16 %v181_v23, %v181_v23 }
 0x1c5   :  { %324 = vmatmul.mubr.msk.bf16.vlgmr.msra.gmra.mrb[4].mxu1 %vm137_vm2, %v182_v25 }
 0x298   :  { %v243_v27 = vpop.f32.mrb[4].mxu1 }
 0x299   :  { %v244_v28 = vadd.f32 %v284_v26, %v243_v27  ;;  %v325_v29 = vpop.f32.mrb[5].mxu1 }
 0x29a   :  { %v246_v30 = vpop.f32.mrb[6].mxu1 }
 0x29b   :  { %249 = vmax.xlane.f32.xlu0 %v244_v28  ;;  %v326_v31 = vpop.f32.mrb[7].mxu1 }
 0x328   :  { %v250_v32 = vpop.xlane.xlu0 %249 }
 0x329   :  { %v251_v33 = vsub.f32 %v244_v28, %v250_v32 }
 0x32b   :  { %v252_v34 = vmul.f32 1.442695, %v251_v33 }
 0x32d   :  { %338 = vpow2.f32 %v252_v34 }
 0x337   :  { %v339_v35 = vpop.eup %338 }
 0x338   :  { %254 = vadd.xlane.f32.xlu0 %v339_v35 }
 0x3c5   :  { %v255_v36 = vpop.xlane.xlu0 %254 }
 0x3c6   :  { %340 = vlog2.f32 %v255_v36 }
 0x3d0   :  { %v341_v37 = vpop.eup %340 }
 0x3d1   :  { %v257_v38 = vmul.f32 0.6931472, %v341_v37 }
 0x3d3   :  { %v258_v39 = vsub.f32 %v251_v33, %v257_v38 }
 0x3d5   :  { %259 = vst [vmem:[#allocation2] sm:$0xff] %v258_v39 }
 0x3d6   :  { %353 = shalt.err (!%p350_p4)
}
 0x3d7   :  { %s354_s23 = scalar_lea.hbm %s469_s7, 128 }
 0x3d8   :  { %p355_p5 = scmp.ne.s32.totalorder %s469_s7, %s354_s23  ;;  %p358_p6 = scmp.lt.u32.totalorder %s354_s23, %s469_s7 }
 0x3da   :  { %p360_p7 = pnand %p358_p6, %p355_p5 }
 0x3dc   :  { %363 = shalt.err (!%p360_p7)
}
 0x3dd   :  { %269 = dma.vmem_to_hbm [thread:$0]  %s267_s5, 128, %s469_s7, [#allocation3]  }
 0x3de   :  { %364 = dma.done.wait [#allocation3], 128  }
 0x3df   :  { %365 = vsyncadd [#allocation3], 4294967168 }
 0x3e0   :  { %273 = vsyncpa [#allocation3], 1 }

// kernel: tpu_custom_call.1
= control target key start
LH: loop header
LB: loop body
LE: loop exit
PB: predicated region body
PF: predicated region fallthrough
CT: control target
= control target key end

     0   :  { %v366_v1 = vmov 0.0   ;;  %vm367_vm0 = vmmov 0   ;;  %s462_s0 = inlined_call_operand.vmem [shape: bf16[8,64], index: 0, kind: input, shape index: {}]   ;;  %s463_s1 = inlined_call_operand.vmem [shape: bf16[64,32], index: 1, kind: input, shape index: {}]   ;;  %s464_s2 = inlined_call_operand.vmem [shape: f32[1,32], index: 2, kind: input, shape index: {}]   ;;  %s465_s3 = inlined_call_operand.vmem [shape: bf16[32,32], index: 3, kind: input, shape index: {}]   ;;  %s466_s4 = inlined_call_operand.vmem [shape: f32[1,32], index: 4, kind: input, shape index: {}]   ;;  %s467_s5 = inlined_call_operand.vmem [shape: bf16[32,128], index: 5, kind: input, shape index: {}]   ;;  %s468_s6 = inlined_call_operand.vmem [shape: f32[1,128], index: 6, kind: input, shape index: {}]   ;;  %s469_s7 = inlined_call_operand.hbm [shape: f32[8,128], index: 7, kind: output, shape index: {}]  }
   0x1   :  { %v330_v0 = vld [vmem:[%s463_s1] sm:$0xff]   ;;  %299 = vmatprep.subr.bf16.mxu0 %v366_v1  ;;  %311 = vmatprep.subr.bf16.mxu1 %v366_v1  ;;  %v331_v2 = vld [vmem:[%s463_s1 + $0x8] sm:$0xff]   ;;  %v332_v3 = vld [vmem:[%s463_s1 + $0x10] sm:$0xff]  }
   0x2   :  { %300 = vmatpush3.bf16.msra.mxu0 %v330_v0  ;;  %307 = vmatprep.mubr.msk.bf16.mxu0 %vm367_vm0, %v366_v1 }
   0x3   :  { %301 = vmatprep.subr.bf16.mxu0 %v366_v1  ;;  %315 = vmatprep.mubr.msk.bf16.mxu1 %vm367_vm0, %v366_v1 }
   0x6   :  { %302 = vmatpush3.bf16.msra.mxu0 %v331_v2 }
   0x7   :  { %303 = vmatprep.subr.bf16.mxu0 %v366_v1 }
   0x8   :  { %12 = vsyncpa [#allocation3], 0  ;;  %v333_v4 = vld [vmem:[%s463_s1 + $0x18] sm:$0xff]   ;;  %v28_v5 = vld [vmem:[%s462_s0] sm:$0xf]  ;;  %vm68_vm1 = vcmask 523264  }
   0x9   :  { %v334_v6 = vld [vmem:[%s465_s3] sm:$0xff]   ;;  %v335_v7 = vld [vmem:[%s465_s3 + $0x8] sm:$0xff]   ;;  %vm137_vm2 = vcmask 261120  }
   0xa   :  { %304 = vmatpush3.bf16.msra.mxu0 %v332_v3  ;;  %312 = vmatpush3.bf16.msra.mxu1 %v334_v6  ;;  %v274_v8 = vld [vmem:[%s464_s2] ss:$0 sm:$0xff]  ;;  %v337_v17 = vld [vmem:[%s467_s5 + $0x8] sm:$0xff]  }
   0xb   :  { %305 = vmatprep.subr.bf16.mxu0 %v366_v1  ;;  %313 = vmatprep.subr.bf16.mxu1 %v366_v1  ;;  %v336_v15 = vld [vmem:[%s467_s5] sm:$0xff]  }
   0xc   :  { %v280_v18 = vld [vmem:[%s466_s4] ss:$0 sm:$0xff]  ;;  %s368_s4 = smov [#allocation2]  }
   0xd   :  { %v284_v26 = vld [vmem:[%s468_s6] ss:$0 sm:$0xff]  ;;  %s266_s5 = sshll.u32 %s368_s4, 4  ;;  %s267_s5 = int_to_ptr.vmem [resolvable:$true] %s266_s5 }
   0xe   :  { %306 = vmatpush3.bf16.msra.mxu0 %v333_v4  ;;  %314 = vmatpush3.bf16.msra.mxu1 %v335_v7  ;;  %s342_s6 = scalar_lea.vmem %s267_s5, 128  ;;  %p347_p1 = scmp.lt.s32.totalorder %s267_s5, %s267_s5 }
   0xf   :  { %319 = vmatprep.subr.bf16.mxu1 %v366_v1  ;;  %p343_p0 = scmp.ne.s32.totalorder %s267_s5, %s342_s6  ;;  %p348_p2 = scmp.lt.s32.totalorder %s342_s6, %s342_s6 }
  0x11   :  { %308 = vmatmul.mubr.msk.bf16.vlgmr.msra.gmra.mrb[0].mxu0 %vm68_vm1, %v28_v5  ;;  %p349_p3 = por %p348_p2, %p347_p1 }
  0x13   :  { %p350_p4 = pnand %p349_p3, %p343_p0 }
  0xe4   :  { %v106_v9 = vpop.f32.mrb[0].mxu0 }
  0xe5   :  { %v107_v10 = vadd.f32 %v274_v8, %v106_v9  ;;  %v309_v11 = vpop.f32.mrb[1].mxu0 }
  0xe6   :  { %v109_v12 = vpop.f32.mrb[2].mxu0 }
  0xe7   :  { %v112_v13 = vmax.f32 %v107_v10, 0.0  ;;  %v310_v14 = vpop.f32.mrb[3].mxu0 }
  0xe9   :  { %v113_v16 = vpack.c.bf16 %v112_v13, %v112_v13 }
  0xeb   :  { %316 = vmatmul.mubr.msk.bf16.vlgmr.msra.gmra.mrb[0].mxu1 %vm137_vm2, %v113_v16 }
  0xec   :  { %320 = vmatpush3.bf16.msra.mxu1 %v336_v15  ;;  %323 = vmatprep.mubr.msk.bf16.mxu1 %vm367_vm0, %v366_v1 }
  0xed   :  { %321 = vmatprep.subr.bf16.mxu1 %v366_v1 }
  0xf0   :  { %322 = vmatpush3.bf16.msra.mxu1 %v337_v17 }
 0x1be   :  { %v175_v19 = vpop.f32.mrb[0].mxu1 }
 0x1bf   :  { %v176_v20 = vadd.f32 %v280_v18, %v175_v19  ;;  %v317_v21 = vpop.f32.mrb[1].mxu1 }
 0x1c0   :  { %v178_v22 = vpop.f32.mrb[2].mxu1 }
 0x1c1   :  { %v181_v23 = vmax.f32 %v176_v20, 0.0  ;;  %v318_v24 = vpop.f32.mrb[3].mxu1 }
 0x1c3   :  { %v182_v25 = vpack.c.bf16 %v181_v23, %v181_v23 }
 0x1c5   :  { %324 = vmatmul.mubr.msk.bf16.vlgmr.msra.gmra.mrb[4].mxu1 %vm137_vm2, %v182_v25 }
 0x298   :  { %v243_v27 = vpop.f32.mrb[4].mxu1 }
 0x299   :  { %v244_v28 = vadd.f32 %v284_v26, %v243_v27  ;;  %v325_v29 = vpop.f32.mrb[5].mxu1 }
 0x29a   :  { %v246_v30 = vpop.f32.mrb[6].mxu1 }
 0x29b   :  { %249 = vmax.xlane.f32.xlu0 %v244_v28  ;;  %v326_v31 = vpop.f32.mrb[7].mxu1 }
 0x328   :  { %v250_v32 = vpop.xlane.xlu0 %249 }
 0x329   :  { %v251_v33 = vsub.f32 %v244_v28, %v250_v32 }
 0x32b   :  { %v252_v34 = vmul.f32 1.442695, %v251_v33 }
 0x32d   :  { %338 = vpow2.f32 %v252_v34 }
 0x337   :  { %v339_v35 = vpop.eup %338 }
 0x338   :  { %254 = vadd.xlane.f32.xlu0 %v339_v35 }
 0x3c5   :  { %v255_v36 = vpop.xlane.xlu0 %254 }
 0x3c6   :  { %340 = vlog2.f32 %v255_v36 }
 0x3d0   :  { %v341_v37 = vpop.eup %340 }
 0x3d1   :  { %v257_v38 = vmul.f32 0.6931472, %v341_v37 }
 0x3d3   :  { %v258_v39 = vsub.f32 %v251_v33, %v257_v38 }
 0x3d5   :  { %259 = vst [vmem:[#allocation2] sm:$0xff] %v258_v39 }
 0x3d6   :  { %353 = shalt.err (!%p350_p4)
}
 0x3d7   :  { %s354_s23 = scalar_lea.hbm %s469_s7, 128 }
 0x3d8   :  { %p355_p5 = scmp.ne.s32.totalorder %s469_s7, %s354_s23  ;;  %p358_p6 = scmp.lt.u32.totalorder %s354_s23, %s469_s7 }
 0x3da   :  { %p360_p7 = pnand %p358_p6, %p355_p5 }
 0x3dc   :  { %363 = shalt.err (!%p360_p7)
}
 0x3dd   :  { %269 = dma.vmem_to_hbm [thread:$0]  %s267_s5, 128, %s469_s7, [#allocation3]  }
 0x3de   :  { %364 = dma.done.wait [#allocation3], 128  }
 0x3df   :  { %365 = vsyncadd [#allocation3], 4294967168 }
 0x3e0   :  { %273 = vsyncpa [#allocation3], 1 }

</bundles_post_ra>
